<compile_context>
chip_gen: v7x
topology: tpu7x:2x2x1
jax: 0.10.0
libtpu: 0.0.40
codegen_flags: <defaults>
</compile_context>

<pallas_src>
import math
import functools

import jax
import jax.numpy as jnp
from jax import lax
from jax.experimental import pallas as pl
from jax.experimental.pallas import tpu as pltpu


# ----------------------------------------------------------------------------
# Kernel helpers
# ----------------------------------------------------------------------------
def _layernorm(h, gamma, beta, eps):
    mu = jnp.mean(h, axis=-1, keepdims=True)
    var = jnp.mean((h - mu) ** 2, axis=-1, keepdims=True)
    return (h - mu) * lax.rsqrt(var + eps) * gamma + beta


# ----------------------------------------------------------------------------
# Fused encoder kernel: one grid step == (one batch block, one layer)
# ----------------------------------------------------------------------------
def encoder_kernel(x_ref,
                   wqkv_ref, bqkv_ref, wo_ref, bo_ref,
                   w1_ref, b1_ref, w2_ref, b2_ref,
                   ln1w_ref, ln1b_ref, ln2w_ref, ln2b_ref,
                   normw_ref, normb_ref,
                   o_ref, *, num_heads, m_real, eps=1e-5):
    l = pl.program_id(1)                      # layer index (inner, "arbitrary")
    n_layers = pl.num_programs(1)
    Bt, Mp, D = x_ref.shape
    H = num_heads
    Dh = D // H
    R = Bt * Mp
    bf16 = jnp.bfloat16

    # Layer 0: initialise the carried activation (VMEM-resident output block).
    @pl.when(l == 0)
    def _():
        o_ref[...] = x_ref[...]

    x = o_ref[...].reshape(R, D)              # [R, D] f32, carried across layers

    # Per-layer weights: streamed blocks (leading depth dim of size 1).
    wqkv = wqkv_ref[0]                        # [D, 3D] bf16 (1/sqrt(Dh) folded into Q part)
    bqkv = bqkv_ref[0]                        # [1, 3D] f32  (scale folded into Q part)
    wo = wo_ref[0]; bo = bo_ref[0]            # [D, D] bf16, [1, D] f32
    w1 = w1_ref[0]; b1 = b1_ref[0]            # [D, F] bf16, [1, F] f32
    w2 = w2_ref[0]; b2 = b2_ref[0]            # [F, D] bf16, [1, D] f32

    # ---- fused QKV projection: one lane-dense [R,D]x[D,3D] bf16 MXU matmul -----
    qkv = jnp.dot(x.astype(bf16), wqkv, preferred_element_type=jnp.float32) + bqkv

    # Head split via static lane slices + stack (no transposes): [R,D] -> [H*Bt, Mp, Dh]
    def to_heads(t2d):
        heads = jnp.stack([t2d[:, h * Dh:(h + 1) * Dh] for h in range(H)], axis=0)
        return heads.reshape(H, Bt, Mp, Dh).reshape(H * Bt, Mp, Dh)

    q = to_heads(qkv[:, 0 * D:1 * D])
    k = to_heads(qkv[:, 1 * D:2 * D])
    v = to_heads(qkv[:, 2 * D:3 * D])

    # ---- scores + softmax (f32 math, exact division) ----------------------------
    s = jnp.einsum('aqe,ake->aqk', q.astype(bf16), k.astype(bf16),
                   preferred_element_type=jnp.float32)        # [H*Bt, Mp, Mp]
    if m_real < Mp:                                           # mask padded key columns
        key_idx = lax.broadcasted_iota(jnp.int32, (1, 1, Mp), 2)
        s = jnp.where(key_idx < m_real, s, -1e30)
    s = s - jnp.max(s, axis=-1, keepdims=True)
    p = jnp.exp(s)
    p = p / jnp.sum(p, axis=-1, keepdims=True)

    # ---- context + single lane-dense output projection ---------------------------
    ctx = jnp.einsum('aqk,ake->aqe', p.astype(bf16), v.astype(bf16),
                     preferred_element_type=jnp.float32)      # [H*Bt, Mp, Dh]
    ctx = ctx.reshape(H, Bt, Mp, Dh).reshape(H, R, Dh)
    ctx = jnp.concatenate([ctx[h] for h in range(H)], axis=-1)   # [R, D] head-major
    attn = jnp.dot(ctx.astype(bf16), wo, preferred_element_type=jnp.float32) + bo

    # ---- residual + LayerNorm1 (f32) ---------------------------------------------
    h1 = _layernorm(x + attn, ln1w_ref[0], ln1b_ref[0], eps)

    # ---- feed-forward (ReLU); bf16 MXU, f32 accumulate -----------------------------
    ff = jnp.dot(h1.astype(bf16), w1, preferred_element_type=jnp.float32) + b1
    ff = jnp.maximum(ff, 0.0)
    ff = jnp.dot(ff.astype(bf16), w2, preferred_element_type=jnp.float32) + b2

    # ---- residual + LayerNorm2 ------------------------------------------------------
    h2 = _layernorm(h1 + ff, ln2w_ref[0], ln2b_ref[0], eps)

    # Carry to the next layer, or (last layer) apply the encoder's final LayerNorm.
    @pl.when(l < n_layers - 1)
    def _():
        o_ref[...] = h2.reshape(Bt, Mp, D)

    @pl.when(l == n_layers - 1)
    def _():
        o_ref[...] = _layernorm(h2, normw_ref[...], normb_ref[...], eps).reshape(Bt, Mp, D)


# ----------------------------------------------------------------------------
# Wrapper (weight packing + pallas_call plumbing)
# ----------------------------------------------------------------------------
def pack_encoder_params(params, num_heads):
    """Stack per-layer params along depth; fold softmax scale into Wq/bq; cast
    matmul weights to bf16 (MXU-native), keep biases / LN params in f32."""
    D = params["embed"].shape[1]
    Dh = D // num_heads
    scale = 1.0 / math.sqrt(Dh)

    def stack(name):
        return jnp.stack([blk[name] for blk in params["blocks"]])

    wqkv = stack("wqkv")                      # (L, D, 3D)
    bqkv = stack("bqkv")                      # (L, 1, 3D)
    q_scale = jnp.concatenate([jnp.full((D,), scale, jnp.float32),
                               jnp.ones((2 * D,), jnp.float32)])
    wqkv = wqkv * q_scale                     # fold 1/sqrt(Dh) into the Q projection
    bqkv = bqkv * q_scale

    bf16 = jnp.bfloat16
    return dict(
        wqkv=wqkv.astype(bf16), bqkv=bqkv.astype(jnp.float32),
        wo=stack("wo").astype(bf16), bo=stack("bo"),
        w1=stack("w1").astype(bf16), b1=stack("b1"),
        w2=stack("w2").astype(bf16), b2=stack("b2"),
        ln1w=stack("ln1w"), ln1b=stack("ln1b"),
        ln2w=stack("ln2w"), ln2b=stack("ln2b"),
    )


def _pick_batch_tile(B, m_pad, row_target=128):
    """Batch rows per grid step: keep >=2 'parallel' blocks when possible (v7x
    megacore) and grow the tile until each step has ~row_target MXU rows."""
    divisors = [d for d in range(1, B + 1) if B % d == 0]
    admissible = [d for d in divisors if B // d >= 2] or [B]
    for d in admissible:
        if d * m_pad >= row_target:
            return d
    return admissible[-1]


def encoder_pallas(x, packed, norm_w, norm_b, *, num_heads):
    """x: [B, M, D] f32 already embedded/masked. Runs all layers + final LN."""
    B, M, D = x.shape
    L = packed["wqkv"].shape[0]
    assert D % num_heads == 0

    # Pad the kept-patch axis to a sublane multiple (8); padded key columns are
    # masked to -inf inside the kernel and padded rows sliced off the output.
    Mp = max(8, -(-M // 8) * 8)
    if Mp != M:
        x = jnp.pad(x, ((0, 0), (0, Mp - M), (0, 0)))
    Bt = _pick_batch_tile(B, Mp)

    names = ("wqkv", "bqkv", "wo", "bo", "w1", "b1", "w2", "b2",
             "ln1w", "ln1b", "ln2w", "ln2b")
    weights = [packed[n] for n in names]

    def layer_spec(a):          # stream one layer per depth step (double-buffered)
        nd = a.ndim
        return pl.BlockSpec((1,) + a.shape[1:],
                            lambda b, l, nd=nd: (l,) + (0,) * (nd - 1))

    def const_spec(a):          # tiny, resident across the whole grid
        nd = a.ndim
        return pl.BlockSpec(a.shape, lambda b, l, nd=nd: (0,) * nd)

    kernel = functools.partial(encoder_kernel, num_heads=num_heads, m_real=M)

    # Explicit VMEM budget: double-buffered per-layer weights + double-buffered
    # activation blocks + headroom for in-kernel intermediates.
    layer_bytes = sum((w.size // L) * w.dtype.itemsize for w in weights)
    io_bytes = Bt * Mp * D * 4
    vmem_limit = int(min(96 << 20, 2 * layer_bytes + 4 * io_bytes + (16 << 20)))

    out = pl.pallas_call(
        kernel,
        out_shape=jax.ShapeDtypeStruct((B, Mp, D), jnp.float32),
        grid=(B // Bt, L),
        in_specs=[pl.BlockSpec((Bt, Mp, D), lambda b, l: (b, 0, 0))]
                 + [layer_spec(w) for w in weights]
                 + [const_spec(norm_w), const_spec(norm_b)],
        out_specs=pl.BlockSpec((Bt, Mp, D), lambda b, l: (b, 0, 0)),
        compiler_params=pltpu.CompilerParams(
            dimension_semantics=("parallel", "arbitrary"),
            vmem_limit_bytes=vmem_limit),
    )(x, *weights, norm_w, norm_b)
    return out[:, :M, :]


def encoder_forward(tokens, params, num_heads, masks=None):
    """JAX/Pallas equivalent of Encoder.forward(x, masks) in eval mode."""
    d_model = params["embed"].shape[1]
    # Embeddings: lookup * sqrt(d_model)   (data-dependent gather kept in glue)
    x = params["embed"][tokens] * math.sqrt(d_model)            # [B, N, D] f32
    # NOTE: the reference forward computes `pos_emb = self.pos_emb(x)` but never
    # uses it, so positional encoding does not affect the output -> skipped.
    if masks is not None:
        B, _, D = x.shape
        idx = jnp.broadcast_to(masks[:, :, None], (B, masks.shape[1], D))
        x = jnp.take_along_axis(x, idx, axis=1)                 # apply_masks
    packed = pack_encoder_params(params, num_heads)
    return encoder_pallas(x.astype(jnp.float32), packed,
                          params["norm_w"], params["norm_b"], num_heads=num_heads)


# ----------------------------------------------------------------------------
# Pure-JAX reference (for validation only)
# ----------------------------------------------------------------------------
def encoder_reference(tokens, params, num_heads, masks=None):
    d_model = params["embed"].shape[1]
    x = params["embed"][tokens] * math.sqrt(d_model)
    if masks is not None:
        B, _, D = x.shape
        idx = jnp.broadcast_to(masks[:, :, None], (B, masks.shape[1], D))
        x = jnp.take_along_axis(x, idx, axis=1)

    def ln(h, w, b, eps=1e-5):
        mu = h.mean(-1, keepdims=True)
        var = ((h - mu) ** 2).mean(-1, keepdims=True)
        return (h - mu) / jnp.sqrt(var + eps) * w + b

    B, M, D = x.shape
    Dh = D // num_heads
    for lp in params["blocks"]:
        qkv = x @ lp["wqkv"] + lp["bqkv"]
        q, k, v = jnp.split(qkv, 3, axis=-1)
        q = q.reshape(B, M, num_heads, Dh).transpose(0, 2, 1, 3)
        k = k.reshape(B, M, num_heads, Dh).transpose(0, 2, 1, 3)
        v = v.reshape(B, M, num_heads, Dh).transpose(0, 2, 1, 3)
        s = (q @ k.transpose(0, 1, 3, 2)) / math.sqrt(Dh)
        p = jax.nn.softmax(s, axis=-1)
        ctx = (p @ v).transpose(0, 2, 1, 3).reshape(B, M, D)
        attn = ctx @ lp["wo"] + lp["bo"]
        h1 = ln(x + attn, lp["ln1w"], lp["ln1b"])
        ff = jnp.maximum(h1 @ lp["w1"] + lp["b1"], 0.0) @ lp["w2"] + lp["b2"]
        x = ln(h1 + ff, lp["ln2w"], lp["ln2b"])
    return ln(x, params["norm_w"], params["norm_b"])


# ----------------------------------------------------------------------------
# Deterministic parameter init (synthetic; shapes follow Encoder.__init__)
# ----------------------------------------------------------------------------
def init_params(key, vocab_size, d_model, mlp_ratio, depth, init_std):
    dff = int(d_model * mlp_ratio)
    k_embed, k_blocks = jax.random.split(key)
    params = {
        # nn.Embedding default init ~ N(0,1) (not touched by _init_weights)
        "embed": jax.random.normal(k_embed, (vocab_size, d_model), jnp.float32),
        "norm_w": jnp.ones((1, d_model), jnp.float32),
        "norm_b": jnp.zeros((1, d_model), jnp.float32),
        "blocks": [],
    }
    for lkey in jax.random.split(k_blocks, depth):
        k1, k2, k3, k4 = jax.random.split(lkey, 4)
        # Linear weights stored pre-transposed as [in, out]; biases as [1, out].
        params["blocks"].append(dict(
            wqkv=(init_std * jax.random.normal(k1, (d_model, 3 * d_model))).astype(jnp.float32),
            bqkv=jnp.zeros((1, 3 * d_model), jnp.float32),
            wo=(init_std * jax.random.normal(k2, (d_model, d_model))).astype(jnp.float32),
            bo=jnp.zeros((1, d_model), jnp.float32),
            w1=(init_std * jax.random.normal(k3, (d_model, dff))).astype(jnp.float32),
            b1=jnp.zeros((1, dff), jnp.float32),
            w2=(init_std * jax.random.normal(k4, (dff, d_model))).astype(jnp.float32),
            b2=jnp.zeros((1, d_model), jnp.float32),
            ln1w=jnp.ones((1, d_model), jnp.float32),
            ln1b=jnp.zeros((1, d_model), jnp.float32),
            ln2w=jnp.ones((1, d_model), jnp.float32),
            ln2b=jnp.zeros((1, d_model), jnp.float32),
        ))
    return params


# ----------------------------------------------------------------------------
if __name__ == "__main__":
    # args: vocab_size=50, embed_dim=32, encoder_num_heads=4, mlp_ratio=4.0,
    #       drop_rate=0.1, encoder_depth=2, init_std=0.02
    VOCAB, D, H, MLP_RATIO, DEPTH, INIT_STD = 50, 32, 4, 4.0, 2, 0.02
    B, N, M_KEEP = 2, 8, 6

    key = jax.random.PRNGKey(0)
    k_param, k_tok, k_mask = jax.random.split(key, 3)

    params = init_params(k_param, VOCAB, D, MLP_RATIO, DEPTH, INIT_STD)
    tokens = jax.random.randint(k_tok, (B, N), 0, VOCAB, dtype=jnp.int32)
    # masks: indices of patches to keep per batch element, shape [B, M_KEEP]
    masks = jnp.stack([
        jnp.sort(jax.random.permutation(k, N)[:M_KEEP])
        for k in jax.random.split(k_mask, B)
    ]).astype(jnp.int32)

    fwd = jax.jit(functools.partial(encoder_forward, num_heads=H))
    out = fwd(tokens, params, masks=masks)
    out = jax.block_until_ready(out)
    assert out.shape == (B, M_KEEP, D), out.shape
    assert bool(jnp.all(jnp.isfinite(out)))

    # Validate against a pure-JAX f32 reference (tolerance covers bf16 MXU matmuls).
    ref = encoder_reference(tokens, params, H, masks=masks)
    max_err = float(jnp.max(jnp.abs(out - ref)))
    assert max_err < 5e-2, f"max abs err vs reference: {max_err}"
    print("KERNEL_OK")
</pallas_src>

<mosaic_0001>
module attributes {stable_mosaic.version = 11 : i64} {
  func.func @encoder_kernel(%arg0: i32, %arg1: i32, %arg2: memref<1x8x32xf32, #tpu.memory_space<vmem>>, %arg3: memref<1x32x96xbf16, #tpu.memory_space<vmem>>, %arg4: memref<1x1x96xf32, #tpu.memory_space<vmem>>, %arg5: memref<1x32x32xbf16, #tpu.memory_space<vmem>>, %arg6: memref<1x1x32xf32, #tpu.memory_space<vmem>>, %arg7: memref<1x32x128xbf16, #tpu.memory_space<vmem>>, %arg8: memref<1x1x128xf32, #tpu.memory_space<vmem>>, %arg9: memref<1x128x32xbf16, #tpu.memory_space<vmem>>, %arg10: memref<1x1x32xf32, #tpu.memory_space<vmem>>, %arg11: memref<1x1x32xf32, #tpu.memory_space<vmem>>, %arg12: memref<1x1x32xf32, #tpu.memory_space<vmem>>, %arg13: memref<1x1x32xf32, #tpu.memory_space<vmem>>, %arg14: memref<1x1x32xf32, #tpu.memory_space<vmem>>, %arg15: memref<1x32xf32, #tpu.memory_space<vmem>>, %arg16: memref<1x32xf32, #tpu.memory_space<vmem>>, %arg17: memref<1x8x32xf32, #tpu.memory_space<vmem>>) attributes {dimension_semantics = [#tpu.dimension_semantics<parallel>, #tpu.dimension_semantics<arbitrary>], iteration_bounds = array<i64: 2, 2>, scalar_prefetch = 0 : i64, scratch_operands = 0 : i64, tpu.core_type = #tpu.core_type<tc>, window_params = [{transform_indices = @transform_0, window_bounds = array<i64: 1, 8, 32>}, {transform_indices = @transform_1, window_bounds = array<i64: 1, 32, 96>}, {transform_indices = @transform_2, window_bounds = array<i64: 1, 1, 96>}, {transform_indices = @transform_3, window_bounds = array<i64: 1, 32, 32>}, {transform_indices = @transform_4, window_bounds = array<i64: 1, 1, 32>}, {transform_indices = @transform_5, window_bounds = array<i64: 1, 32, 128>}, {transform_indices = @transform_6, window_bounds = array<i64: 1, 1, 128>}, {transform_indices = @transform_7, window_bounds = array<i64: 1, 128, 32>}, {transform_indices = @transform_8, window_bounds = array<i64: 1, 1, 32>}, {transform_indices = @transform_9, window_bounds = array<i64: 1, 1, 32>}, {transform_indices = @transform_10, window_bounds = array<i64: 1, 1, 32>}, {transform_indices = @transform_11, window_bounds = array<i64: 1, 1, 32>}, {transform_indices = @transform_12, window_bounds = array<i64: 1, 1, 32>}, {pipeline_mode = #tpu.pipeline_mode<synchronous>, transform_indices = @transform_13, window_bounds = array<i64: 1, 32>}, {pipeline_mode = #tpu.pipeline_mode<synchronous>, transform_indices = @transform_14, window_bounds = array<i64: 1, 32>}, {transform_indices = @transform_15, window_bounds = array<i64: 1, 8, 32>}]} {
    %c0_i32 = arith.constant 0 : i32
    %0 = arith.cmpi eq, %arg1, %c0_i32 : i32
    %1 = arith.extui %0 : i1 to i32
    %c0_i32_0 = arith.constant 0 : i32
    %2 = arith.cmpi ne, %1, %c0_i32_0 : i32
    scf.if %2 {
      %c0_61 = arith.constant 0 : index
      %c0_62 = arith.constant 0 : index
      %c0_63 = arith.constant 0 : index
      %168 = vector.load %arg2[%c0_61, %c0_62, %c0_63] : memref<1x8x32xf32, #tpu.memory_space<vmem>>, vector<1x8x32xf32>
      %c0_64 = arith.constant 0 : index
      %c0_65 = arith.constant 0 : index
      %c0_66 = arith.constant 0 : index
      %169 = vector.load %arg17[%c0_64, %c0_65, %c0_66] : memref<1x8x32xf32, #tpu.memory_space<vmem>>, vector<1x8x32xf32>
      tpu.vector_store %arg17[%c0_64, %c0_65, %c0_66], %168 {strides = array<i32>} : memref<1x8x32xf32, #tpu.memory_space<vmem>>, vector<1x8x32xf32>,
    } else {
    }
    %c0 = arith.constant 0 : index
    %c0_1 = arith.constant 0 : index
    %c0_2 = arith.constant 0 : index
    %3 = vector.load %arg17[%c0, %c0_1, %c0_2] : memref<1x8x32xf32, #tpu.memory_space<vmem>>, vector<1x8x32xf32>
    %4 = vector.shape_cast %3 : vector<1x8x32xf32> to vector<8x32xf32>
    %c0_3 = arith.constant 0 : index
    %c0_4 = arith.constant 0 : index
    %c0_5 = arith.constant 0 : index
    %5 = vector.load %arg3[%c0_3, %c0_4, %c0_5] : memref<1x32x96xbf16, #tpu.memory_space<vmem>>, vector<1x32x96xbf16>
    %6 = vector.shape_cast %5 : vector<1x32x96xbf16> to vector<32x96xbf16>
    %c0_6 = arith.constant 0 : index
    %c0_7 = arith.constant 0 : index
    %c0_8 = arith.constant 0 : index
    %7 = vector.load %arg4[%c0_6, %c0_7, %c0_8] : memref<1x1x96xf32, #tpu.memory_space<vmem>>, vector<1x1x96xf32>
    %8 = vector.shape_cast %7 : vector<1x1x96xf32> to vector<1x96xf32>
    %c0_9 = arith.constant 0 : index
    %c0_10 = arith.constant 0 : index
    %c0_11 = arith.constant 0 : index
    %9 = vector.load %arg5[%c0_9, %c0_10, %c0_11] : memref<1x32x32xbf16, #tpu.memory_space<vmem>>, vector<1x32x32xbf16>
    %10 = vector.shape_cast %9 : vector<1x32x32xbf16> to vector<32x32xbf16>
    %c0_12 = arith.constant 0 : index
    %c0_13 = arith.constant 0 : index
    %c0_14 = arith.constant 0 : index
    %11 = vector.load %arg6[%c0_12, %c0_13, %c0_14] : memref<1x1x32xf32, #tpu.memory_space<vmem>>, vector<1x1x32xf32>
    %12 = vector.shape_cast %11 : vector<1x1x32xf32> to vector<1x32xf32>
    %c0_15 = arith.constant 0 : index
    %c0_16 = arith.constant 0 : index
    %c0_17 = arith.constant 0 : index
    %13 = vector.load %arg7[%c0_15, %c0_16, %c0_17] : memref<1x32x128xbf16, #tpu.memory_space<vmem>>, vector<1x32x128xbf16>
    %14 = vector.shape_cast %13 : vector<1x32x128xbf16> to vector<32x128xbf16>
    %c0_18 = arith.constant 0 : index
    %c0_19 = arith.constant 0 : index
    %c0_20 = arith.constant 0 : index
    %15 = vector.load %arg8[%c0_18, %c0_19, %c0_20] : memref<1x1x128xf32, #tpu.memory_space<vmem>>, vector<1x1x128xf32>
    %16 = vector.shape_cast %15 : vector<1x1x128xf32> to vector<1x128xf32>
    %c0_21 = arith.constant 0 : index
    %c0_22 = arith.constant 0 : index
    %c0_23 = arith.constant 0 : index
    %17 = vector.load %arg9[%c0_21, %c0_22, %c0_23] : memref<1x128x32xbf16, #tpu.memory_space<vmem>>, vector<1x128x32xbf16>
    %18 = vector.shape_cast %17 : vector<1x128x32xbf16> to vector<128x32xbf16>
    %c0_24 = arith.constant 0 : index
    %c0_25 = arith.constant 0 : index
    %c0_26 = arith.constant 0 : index
    %19 = vector.load %arg10[%c0_24, %c0_25, %c0_26] : memref<1x1x32xf32, #tpu.memory_space<vmem>>, vector<1x1x32xf32>
    %20 = vector.shape_cast %19 : vector<1x1x32xf32> to vector<1x32xf32>
    %21 = arith.truncf %4 : vector<8x32xf32> to vector<8x32xbf16>
    %cst = arith.constant dense<0.000000e+00> : vector<8x96xf32>
    %22 = tpu.matmul %21, %6, %cst {dimension_numbers = #tpu.dot_dimension_numbers<[1], [0], [0], [1], [0, 0, 1, 1], [], []>} : vector<8x32xbf16>, vector<32x96xbf16>, vector<8x96xf32> -> vector<8x96xf32>
    %23 = vector.broadcast %8 : vector<1x96xf32> to vector<8x96xf32>
    %24 = arith.addf %22, %23 : vector<8x96xf32>
    %25 = vector.extract_strided_slice %24 {offsets = [0, 0], sizes = [8, 32], strides = [1, 1]} : vector<8x96xf32> to vector<8x32xf32>
    %26 = vector.extract_strided_slice %25 {offsets = [0, 0], sizes = [8, 8], strides = [1, 1]} : vector<8x32xf32> to vector<8x8xf32>
    %27 = vector.extract_strided_slice %25 {offsets = [0, 8], sizes = [8, 8], strides = [1, 1]} : vector<8x32xf32> to vector<8x8xf32>
    %28 = vector.extract_strided_slice %25 {offsets = [0, 16], sizes = [8, 8], strides = [1, 1]} : vector<8x32xf32> to vector<8x8xf32>
    %29 = vector.extract_strided_slice %25 {offsets = [0, 24], sizes = [8, 8], strides = [1, 1]} : vector<8x32xf32> to vector<8x8xf32>
    %30 = vector.shape_cast %26 : vector<8x8xf32> to vector<1x8x8xf32>
    %31 = vector.shape_cast %27 : vector<8x8xf32> to vector<1x8x8xf32>
    %32 = vector.shape_cast %28 : vector<8x8xf32> to vector<1x8x8xf32>
    %33 = vector.shape_cast %29 : vector<8x8xf32> to vector<1x8x8xf32>
    %34 = tpu.concatenate %30, %31, %32, %33 in 0 : vector<1x8x8xf32>, vector<1x8x8xf32>, vector<1x8x8xf32>, vector<1x8x8xf32> -> vector<4x8x8xf32>
    %35 = vector.shape_cast %34 : vector<4x8x8xf32> to vector<4x1x8x8xf32>
    %36 = vector.shape_cast %35 : vector<4x1x8x8xf32> to vector<4x8x8xf32>
    %37 = vector.extract_strided_slice %24 {offsets = [0, 32], sizes = [8, 32], strides = [1, 1]} : vector<8x96xf32> to vector<8x32xf32>
    %38 = vector.extract_strided_slice %37 {offsets = [0, 0], sizes = [8, 8], strides = [1, 1]} : vector<8x32xf32> to vector<8x8xf32>
    %39 = vector.extract_strided_slice %37 {offsets = [0, 8], sizes = [8, 8], strides = [1, 1]} : vector<8x32xf32> to vector<8x8xf32>
    %40 = vector.extract_strided_slice %37 {offsets = [0, 16], sizes = [8, 8], strides = [1, 1]} : vector<8x32xf32> to vector<8x8xf32>
    %41 = vector.extract_strided_slice %37 {offsets = [0, 24], sizes = [8, 8], strides = [1, 1]} : vector<8x32xf32> to vector<8x8xf32>
    %42 = vector.shape_cast %38 : vector<8x8xf32> to vector<1x8x8xf32>
    %43 = vector.shape_cast %39 : vector<8x8xf32> to vector<1x8x8xf32>
    %44 = vector.shape_cast %40 : vector<8x8xf32> to vector<1x8x8xf32>
    %45 = vector.shape_cast %41 : vector<8x8xf32> to vector<1x8x8xf32>
    %46 = tpu.concatenate %42, %43, %44, %45 in 0 : vector<1x8x8xf32>, vector<1x8x8xf32>, vector<1x8x8xf32>, vector<1x8x8xf32> -> vector<4x8x8xf32>
    %47 = vector.shape_cast %46 : vector<4x8x8xf32> to vector<4x1x8x8xf32>
    %48 = vector.shape_cast %47 : vector<4x1x8x8xf32> to vector<4x8x8xf32>
    %49 = vector.extract_strided_slice %24 {offsets = [0, 64], sizes = [8, 32], strides = [1, 1]} : vector<8x96xf32> to vector<8x32xf32>
    %50 = vector.extract_strided_slice %49 {offsets = [0, 0], sizes = [8, 8], strides = [1, 1]} : vector<8x32xf32> to vector<8x8xf32>
    %51 = vector.extract_strided_slice %49 {offsets = [0, 8], sizes = [8, 8], strides = [1, 1]} : vector<8x32xf32> to vector<8x8xf32>
    %52 = vector.extract_strided_slice %49 {offsets = [0, 16], sizes = [8, 8], strides = [1, 1]} : vector<8x32xf32> to vector<8x8xf32>
    %53 = vector.extract_strided_slice %49 {offsets = [0, 24], sizes = [8, 8], strides = [1, 1]} : vector<8x32xf32> to vector<8x8xf32>
    %54 = vector.shape_cast %50 : vector<8x8xf32> to vector<1x8x8xf32>
    %55 = vector.shape_cast %51 : vector<8x8xf32> to vector<1x8x8xf32>
    %56 = vector.shape_cast %52 : vector<8x8xf32> to vector<1x8x8xf32>
    %57 = vector.shape_cast %53 : vector<8x8xf32> to vector<1x8x8xf32>
    %58 = tpu.concatenate %54, %55, %56, %57 in 0 : vector<1x8x8xf32>, vector<1x8x8xf32>, vector<1x8x8xf32>, vector<1x8x8xf32> -> vector<4x8x8xf32>
    %59 = vector.shape_cast %58 : vector<4x8x8xf32> to vector<4x1x8x8xf32>
    %60 = vector.shape_cast %59 : vector<4x1x8x8xf32> to vector<4x8x8xf32>
    %61 = arith.truncf %36 : vector<4x8x8xf32> to vector<4x8x8xbf16>
    %62 = arith.truncf %48 : vector<4x8x8xf32> to vector<4x8x8xbf16>
    "tpu.trace_start"() <{level = 10 : i32, message = "aqe,ake->aqk"}> : () -> ()
    %cst_27 = arith.constant dense<0.000000e+00> : vector<4x8x8xf32>
    %63 = tpu.matmul %61, %62, %cst_27 {dimension_numbers = #tpu.dot_dimension_numbers<[2], [2], [1], [1], [0, 0, 0, 1, 1, 1], [0], [0]>} : vector<4x8x8xbf16>, vector<4x8x8xbf16>, vector<4x8x8xf32> -> vector<4x8x8xf32>
    "tpu.trace_stop"() : () -> ()
    %64 = tpu.iota {dimensions = array<i32: 2>} : vector<1x1x8xi32>
    %c6_i32 = arith.constant 6 : i32
    %65 = vector.broadcast %c6_i32 : i32 to vector<1x1x8xi32>
    %66 = arith.cmpi slt, %64, %65 : vector<1x1x8xi32>
    %cst_28 = arith.constant -1.000000e+30 : f32
    %67 = vector.shape_cast %66 : vector<1x1x8xi1> to vector<1x1x8xi1>
    %68 = vector.broadcast %67 : vector<1x1x8xi1> to vector<4x8x8xi1>
    %69 = vector.broadcast %cst_28 : f32 to vector<4x8x8xf32>
    %70 = arith.select %68, %63, %69 : vector<4x8x8xi1>, vector<4x8x8xf32>
    %cst_29 = arith.constant dense<0xFF800000> : vector<4x8xf32>
    %71 = vector.multi_reduction <maximumf>, %70, %cst_29 [2] : vector<4x8x8xf32> to vector<4x8xf32>
    %72 = vector.shape_cast %71 : vector<4x8xf32> to vector<4x8x1xf32>
    %73 = vector.broadcast %72 : vector<4x8x1xf32> to vector<4x8x8xf32>
    %74 = arith.subf %70, %73 : vector<4x8x8xf32>
    %75 = math.exp %74 : vector<4x8x8xf32>
    %cst_30 = arith.constant dense<0.000000e+00> : vector<4x8xf32>
    %76 = vector.multi_reduction <add>, %75, %cst_30 [2] : vector<4x8x8xf32> to vector<4x8xf32>
    %77 = vector.shape_cast %76 : vector<4x8xf32> to vector<4x8x1xf32>
    %78 = vector.broadcast %77 : vector<4x8x1xf32> to vector<4x8x8xf32>
    %79 = arith.divf %75, %78 : vector<4x8x8xf32>
    %80 = arith.truncf %79 : vector<4x8x8xf32> to vector<4x8x8xbf16>
    %81 = arith.truncf %60 : vector<4x8x8xf32> to vector<4x8x8xbf16>
    "tpu.trace_start"() <{level = 10 : i32, message = "aqk,ake->aqe"}> : () -> ()
    %cst_31 = arith.constant dense<0.000000e+00> : vector<4x8x8xf32>
    %82 = tpu.matmul %80, %81, %cst_31 {dimension_numbers = #tpu.dot_dimension_numbers<[2], [1], [1], [2], [0, 0, 0, 1, 1, 2], [0], [0]>} : vector<4x8x8xbf16>, vector<4x8x8xbf16>, vector<4x8x8xf32> -> vector<4x8x8xf32>
    "tpu.trace_stop"() : () -> ()
    %83 = vector.shape_cast %82 : vector<4x8x8xf32> to vector<4x1x8x8xf32>
    %84 = vector.shape_cast %83 : vector<4x1x8x8xf32> to vector<4x8x8xf32>
    %85 = vector.extract_strided_slice %84 {offsets = [0, 0, 0], sizes = [1, 8, 8], strides = [1, 1, 1]} : vector<4x8x8xf32> to vector<1x8x8xf32>
    %86 = vector.shape_cast %85 : vector<1x8x8xf32> to vector<8x8xf32>
    %87 = vector.extract_strided_slice %84 {offsets = [1, 0, 0], sizes = [1, 8, 8], strides = [1, 1, 1]} : vector<4x8x8xf32> to vector<1x8x8xf32>
    %88 = vector.shape_cast %87 : vector<1x8x8xf32> to vector<8x8xf32>
    %89 = vector.extract_strided_slice %84 {offsets = [2, 0, 0], sizes = [1, 8, 8], strides = [1, 1, 1]} : vector<4x8x8xf32> to vector<1x8x8xf32>
    %90 = vector.shape_cast %89 : vector<1x8x8xf32> to vector<8x8xf32>
    %91 = vector.extract_strided_slice %84 {offsets = [3, 0, 0], sizes = [1, 8, 8], strides = [1, 1, 1]} : vector<4x8x8xf32> to vector<1x8x8xf32>
    %92 = vector.shape_cast %91 : vector<1x8x8xf32> to vector<8x8xf32>
    %93 = tpu.concatenate %86, %88, %90, %92 in 1 : vector<8x8xf32>, vector<8x8xf32>, vector<8x8xf32>, vector<8x8xf32> -> vector<8x32xf32>
    %94 = arith.truncf %93 : vector<8x32xf32> to vector<8x32xbf16>
    %cst_32 = arith.constant dense<0.000000e+00> : vector<8x32xf32>
    %95 = tpu.matmul %94, %10, %cst_32 {dimension_numbers = #tpu.dot_dimension_numbers<[1], [0], [0], [1], [0, 0, 1, 1], [], []>} : vector<8x32xbf16>, vector<32x32xbf16>, vector<8x32xf32> -> vector<8x32xf32>
    %96 = vector.broadcast %12 : vector<1x32xf32> to vector<8x32xf32>
    %97 = arith.addf %95, %96 : vector<8x32xf32>
    %98 = arith.addf %4, %97 : vector<8x32xf32>
    %c0_33 = arith.constant 0 : index
    %c0_34 = arith.constant 0 : index
    %c0_35 = arith.constant 0 : index
    %99 = vector.load %arg11[%c0_33, %c0_34, %c0_35] : memref<1x1x32xf32, #tpu.memory_space<vmem>>, vector<1x1x32xf32>
    %100 = vector.shape_cast %99 : vector<1x1x32xf32> to vector<1x32xf32>
    %c0_36 = arith.constant 0 : index
    %c0_37 = arith.constant 0 : index
    %c0_38 = arith.constant 0 : index
    %101 = vector.load %arg12[%c0_36, %c0_37, %c0_38] : memref<1x1x32xf32, #tpu.memory_space<vmem>>, vector<1x1x32xf32>
    %102 = vector.shape_cast %101 : vector<1x1x32xf32> to vector<1x32xf32>
    %cst_39 = arith.constant dense<0.000000e+00> : vector<8xf32>
    %103 = vector.multi_reduction <add>, %98, %cst_39 [1] : vector<8x32xf32> to vector<8xf32>
    %104 = vector.shape_cast %103 : vector<8xf32> to vector<8x1xf32>
    %cst_40 = arith.constant 3.200000e+01 : f32
    %105 = vector.broadcast %cst_40 : f32 to vector<8x1xf32>
    %106 = arith.divf %104, %105 : vector<8x1xf32>
    %107 = vector.broadcast %106 : vector<8x1xf32> to vector<8x32xf32>
    %108 = arith.subf %98, %107 : vector<8x32xf32>
    %109 = arith.mulf %108, %108 : vector<8x32xf32>
    %cst_41 = arith.constant dense<0.000000e+00> : vector<8xf32>
    %110 = vector.multi_reduction <add>, %109, %cst_41 [1] : vector<8x32xf32> to vector<8xf32>
    %111 = vector.shape_cast %110 : vector<8xf32> to vector<8x1xf32>
    %cst_42 = arith.constant 3.200000e+01 : f32
    %112 = vector.broadcast %cst_42 : f32 to vector<8x1xf32>
    %113 = arith.divf %111, %112 : vector<8x1xf32>
    %114 = vector.broadcast %106 : vector<8x1xf32> to vector<8x32xf32>
    %115 = arith.subf %98, %114 : vector<8x32xf32>
    %cst_43 = arith.constant 9.99999974E-6 : f32
    %116 = vector.broadcast %cst_43 : f32 to vector<8x1xf32>
    %117 = arith.addf %113, %116 : vector<8x1xf32>
    %118 = math.rsqrt %117 : vector<8x1xf32>
    %119 = vector.broadcast %118 : vector<8x1xf32> to vector<8x32xf32>
    %120 = arith.mulf %115, %119 : vector<8x32xf32>
    %121 = vector.broadcast %100 : vector<1x32xf32> to vector<8x32xf32>
    %122 = arith.mulf %120, %121 : vector<8x32xf32>
    %123 = vector.broadcast %102 : vector<1x32xf32> to vector<8x32xf32>
    %124 = arith.addf %122, %123 : vector<8x32xf32>
    %125 = arith.truncf %124 : vector<8x32xf32> to vector<8x32xbf16>
    %cst_44 = arith.constant dense<0.000000e+00> : vector<8x128xf32>
    %126 = tpu.matmul %125, %14, %cst_44 {dimension_numbers = #tpu.dot_dimension_numbers<[1], [0], [0], [1], [0, 0, 1, 1], [], []>} : vector<8x32xbf16>, vector<32x128xbf16>, vector<8x128xf32> -> vector<8x128xf32>
    %127 = vector.broadcast %16 : vector<1x128xf32> to vector<8x128xf32>
    %128 = arith.addf %126, %127 : vector<8x128xf32>
    %cst_45 = arith.constant 0.000000e+00 : f32
    %129 = vector.broadcast %cst_45 : f32 to vector<8x128xf32>
    %130 = arith.maximumf %128, %129 : vector<8x128xf32>
    %131 = arith.truncf %130 : vector<8x128xf32> to vector<8x128xbf16>
    %cst_46 = arith.constant dense<0.000000e+00> : vector<8x32xf32>
    %132 = tpu.matmul %131, %18, %cst_46 {dimension_numbers = #tpu.dot_dimension_numbers<[1], [0], [0], [1], [0, 0, 1, 1], [], []>} : vector<8x128xbf16>, vector<128x32xbf16>, vector<8x32xf32> -> vector<8x32xf32>
    %133 = vector.broadcast %20 : vector<1x32xf32> to vector<8x32xf32>
    %134 = arith.addf %132, %133 : vector<8x32xf32>
    %135 = arith.addf %124, %134 : vector<8x32xf32>
    %c0_47 = arith.constant 0 : index
    %c0_48 = arith.constant 0 : index
    %c0_49 = arith.constant 0 : index
    %136 = vector.load %arg13[%c0_47, %c0_48, %c0_49] : memref<1x1x32xf32, #tpu.memory_space<vmem>>, vector<1x1x32xf32>
    %137 = vector.shape_cast %136 : vector<1x1x32xf32> to vector<1x32xf32>
    %c0_50 = arith.constant 0 : index
    %c0_51 = arith.constant 0 : index
    %c0_52 = arith.constant 0 : index
    %138 = vector.load %arg14[%c0_50, %c0_51, %c0_52] : memref<1x1x32xf32, #tpu.memory_space<vmem>>, vector<1x1x32xf32>
    %139 = vector.shape_cast %138 : vector<1x1x32xf32> to vector<1x32xf32>
    %cst_53 = arith.constant dense<0.000000e+00> : vector<8xf32>
    %140 = vector.multi_reduction <add>, %135, %cst_53 [1] : vector<8x32xf32> to vector<8xf32>
    %141 = vector.shape_cast %140 : vector<8xf32> to vector<8x1xf32>
    %cst_54 = arith.constant 3.200000e+01 : f32
    %142 = vector.broadcast %cst_54 : f32 to vector<8x1xf32>
    %143 = arith.divf %141, %142 : vector<8x1xf32>
    %144 = vector.broadcast %143 : vector<8x1xf32> to vector<8x32xf32>
    %145 = arith.subf %135, %144 : vector<8x32xf32>
    %146 = arith.mulf %145, %145 : vector<8x32xf32>
    %cst_55 = arith.constant dense<0.000000e+00> : vector<8xf32>
    %147 = vector.multi_reduction <add>, %146, %cst_55 [1] : vector<8x32xf32> to vector<8xf32>
    %148 = vector.shape_cast %147 : vector<8xf32> to vector<8x1xf32>
    %cst_56 = arith.constant 3.200000e+01 : f32
    %149 = vector.broadcast %cst_56 : f32 to vector<8x1xf32>
    %150 = arith.divf %148, %149 : vector<8x1xf32>
    %151 = vector.broadcast %143 : vector<8x1xf32> to vector<8x32xf32>
    %152 = arith.subf %135, %151 : vector<8x32xf32>
    %cst_57 = arith.constant 9.99999974E-6 : f32
    %153 = vector.broadcast %cst_57 : f32 to vector<8x1xf32>
    %154 = arith.addf %150, %153 : vector<8x1xf32>
    %155 = math.rsqrt %154 : vector<8x1xf32>
    %156 = vector.broadcast %155 : vector<8x1xf32> to vector<8x32xf32>
    %157 = arith.mulf %152, %156 : vector<8x32xf32>
    %158 = vector.broadcast %137 : vector<1x32xf32> to vector<8x32xf32>
    %159 = arith.mulf %157, %158 : vector<8x32xf32>
    %160 = vector.broadcast %139 : vector<1x32xf32> to vector<8x32xf32>
    %161 = arith.addf %159, %160 : vector<8x32xf32>
    %c1_i32 = arith.constant 1 : i32
    %162 = arith.cmpi slt, %arg1, %c1_i32 : i32
    %163 = arith.extui %162 : i1 to i32
    %c0_i32_58 = arith.constant 0 : i32
    %164 = arith.cmpi ne, %163, %c0_i32_58 : i32
    scf.if %164 {
      %168 = vector.shape_cast %161 : vector<8x32xf32> to vector<1x8x32xf32>
      %c0_61 = arith.constant 0 : index
      %c0_62 = arith.constant 0 : index
      %c0_63 = arith.constant 0 : index
      %169 = vector.load %arg17[%c0_61, %c0_62, %c0_63] : memref<1x8x32xf32, #tpu.memory_space<vmem>>, vector<1x8x32xf32>
      tpu.vector_store %arg17[%c0_61, %c0_62, %c0_63], %168 {strides = array<i32>} : memref<1x8x32xf32, #tpu.memory_space<vmem>>, vector<1x8x32xf32>,
    } else {
    }
    %c1_i32_59 = arith.constant 1 : i32
    %165 = arith.cmpi eq, %arg1, %c1_i32_59 : i32
    %166 = arith.extui %165 : i1 to i32
    %c0_i32_60 = arith.constant 0 : i32
    %167 = arith.cmpi ne, %166, %c0_i32_60 : i32
    scf.if %167 {
      %c0_61 = arith.constant 0 : index
      %c0_62 = arith.constant 0 : index
      %168 = vector.load %arg15[%c0_61, %c0_62] : memref<1x32xf32, #tpu.memory_space<vmem>>, vector<1x32xf32>
      %c0_63 = arith.constant 0 : index
      %c0_64 = arith.constant 0 : index
      %169 = vector.load %arg16[%c0_63, %c0_64] : memref<1x32xf32, #tpu.memory_space<vmem>>, vector<1x32xf32>
      %cst_65 = arith.constant dense<0.000000e+00> : vector<8xf32>
      %170 = vector.multi_reduction <add>, %161, %cst_65 [1] : vector<8x32xf32> to vector<8xf32>
      %171 = vector.shape_cast %170 : vector<8xf32> to vector<8x1xf32>
      %cst_66 = arith.constant 3.200000e+01 : f32
      %172 = vector.broadcast %cst_66 : f32 to vector<8x1xf32>
      %173 = arith.divf %171, %172 : vector<8x1xf32>
      %174 = vector.broadcast %173 : vector<8x1xf32> to vector<8x32xf32>
      %175 = arith.subf %161, %174 : vector<8x32xf32>
      %176 = arith.mulf %175, %175 : vector<8x32xf32>
      %cst_67 = arith.constant dense<0.000000e+00> : vector<8xf32>
      %177 = vector.multi_reduction <add>, %176, %cst_67 [1] : vector<8x32xf32> to vector<8xf32>
      %178 = vector.shape_cast %177 : vector<8xf32> to vector<8x1xf32>
      %cst_68 = arith.constant 3.200000e+01 : f32
      %179 = vector.broadcast %cst_68 : f32 to vector<8x1xf32>
      %180 = arith.divf %178, %179 : vector<8x1xf32>
      %181 = vector.broadcast %173 : vector<8x1xf32> to vector<8x32xf32>
      %182 = arith.subf %161, %181 : vector<8x32xf32>
      %cst_69 = arith.constant 9.99999974E-6 : f32
      %183 = vector.broadcast %cst_69 : f32 to vector<8x1xf32>
      %184 = arith.addf %180, %183 : vector<8x1xf32>
      %185 = math.rsqrt %184 : vector<8x1xf32>
      %186 = vector.broadcast %185 : vector<8x1xf32> to vector<8x32xf32>
      %187 = arith.mulf %182, %186 : vector<8x32xf32>
      %188 = vector.broadcast %168 : vector<1x32xf32> to vector<8x32xf32>
      %189 = arith.mulf %187, %188 : vector<8x32xf32>
      %190 = vector.broadcast %169 : vector<1x32xf32> to vector<8x32xf32>
      %191 = arith.addf %189, %190 : vector<8x32xf32>
      %192 = vector.shape_cast %191 : vector<8x32xf32> to vector<1x8x32xf32>
      %c0_70 = arith.constant 0 : index
      %c0_71 = arith.constant 0 : index
      %c0_72 = arith.constant 0 : index
      %193 = vector.load %arg17[%c0_70, %c0_71, %c0_72] : memref<1x8x32xf32, #tpu.memory_space<vmem>>, vector<1x8x32xf32>
      tpu.vector_store %arg17[%c0_70, %c0_71, %c0_72], %192 {strides = array<i32>} : memref<1x8x32xf32, #tpu.memory_space<vmem>>, vector<1x8x32xf32>,
    } else {
    }
    return
  }
  func.func @transform_0(%arg0: i32, %arg1: i32) -> (i32, i32, i32) {
    %c0_i32 = arith.constant 0 : i32
    %c0_i32_0 = arith.constant 0 : i32
    %c0_i32_1 = arith.constant 0 : i32
    return %arg0, %c0_i32, %c0_i32_0 : i32, i32, i32
  }
  func.func @transform_1(%arg0: i32, %arg1: i32) -> (i32, i32, i32) {
    %c0_i32 = arith.constant 0 : i32
    %c0_i32_0 = arith.constant 0 : i32
    %c0_i32_1 = arith.constant 0 : i32
    return %arg1, %c0_i32, %c0_i32_0 : i32, i32, i32
  }
  func.func @transform_2(%arg0: i32, %arg1: i32) -> (i32, i32, i32) {
    %c0_i32 = arith.constant 0 : i32
    %c0_i32_0 = arith.constant 0 : i32
    %c0_i32_1 = arith.constant 0 : i32
    return %arg1, %c0_i32, %c0_i32_0 : i32, i32, i32
  }
  func.func @transform_3(%arg0: i32, %arg1: i32) -> (i32, i32, i32) {
    %c0_i32 = arith.constant 0 : i32
    %c0_i32_0 = arith.constant 0 : i32
    %c0_i32_1 = arith.constant 0 : i32
    return %arg1, %c0_i32, %c0_i32_0 : i32, i32, i32
  }
  func.func @transform_4(%arg0: i32, %arg1: i32) -> (i32, i32, i32) {
    %c0_i32 = arith.constant 0 : i32
    %c0_i32_0 = arith.constant 0 : i32
    %c0_i32_1 = arith.constant 0 : i32
    return %arg1, %c0_i32, %c0_i32_0 : i32, i32, i32
  }
  func.func @transform_5(%arg0: i32, %arg1: i32) -> (i32, i32, i32) {
    %c0_i32 = arith.constant 0 : i32
    %c0_i32_0 = arith.constant 0 : i32
    %c0_i32_1 = arith.constant 0 : i32
    return %arg1, %c0_i32, %c0_i32_0 : i32, i32, i32
  }
  func.func @transform_6(%arg0: i32, %arg1: i32) -> (i32, i32, i32) {
    %c0_i32 = arith.constant 0 : i32
    %c0_i32_0 = arith.constant 0 : i32
    %c0_i32_1 = arith.constant 0 : i32
    return %arg1, %c0_i32, %c0_i32_0 : i32, i32, i32
  }
  func.func @transform_7(%arg0: i32, %arg1: i32) -> (i32, i32, i32) {
    %c0_i32 = arith.constant 0 : i32
    %c0_i32_0 = arith.constant 0 : i32
    %c0_i32_1 = arith.constant 0 : i32
    return %arg1, %c0_i32, %c0_i32_0 : i32, i32, i32
  }
  func.func @transform_8(%arg0: i32, %arg1: i32) -> (i32, i32, i32) {
    %c0_i32 = arith.constant 0 : i32
    %c0_i32_0 = arith.constant 0 : i32
    %c0_i32_1 = arith.constant 0 : i32
    return %arg1, %c0_i32, %c0_i32_0 : i32, i32, i32
  }
  func.func @transform_9(%arg0: i32, %arg1: i32) -> (i32, i32, i32) {
    %c0_i32 = arith.constant 0 : i32
    %c0_i32_0 = arith.constant 0 : i32
    %c0_i32_1 = arith.constant 0 : i32
    return %arg1, %c0_i32, %c0_i32_0 : i32, i32, i32
  }
  func.func @transform_10(%arg0: i32, %arg1: i32) -> (i32, i32, i32) {
    %c0_i32 = arith.constant 0 : i32
    %c0_i32_0 = arith.constant 0 : i32
    %c0_i32_1 = arith.constant 0 : i32
    return %arg1, %c0_i32, %c0_i32_0 : i32, i32, i32
  }
  func.func @transform_11(%arg0: i32, %arg1: i32) -> (i32, i32, i32) {
    %c0_i32 = arith.constant 0 : i32
    %c0_i32_0 = arith.constant 0 : i32
    %c0_i32_1 = arith.constant 0 : i32
    return %arg1, %c0_i32, %c0_i32_0 : i32, i32, i32
  }
  func.func @transform_12(%arg0: i32, %arg1: i32) -> (i32, i32, i32) {
    %c0_i32 = arith.constant 0 : i32
    %c0_i32_0 = arith.constant 0 : i32
    %c0_i32_1 = arith.constant 0 : i32
    return %arg1, %c0_i32, %c0_i32_0 : i32, i32, i32
  }
  func.func @transform_13(%arg0: i32, %arg1: i32) -> (i32, i32) {
    %c0_i32 = arith.constant 0 : i32
    %c0_i32_0 = arith.constant 0 : i32
    %c0_i32_1 = arith.constant 0 : i32
    return %c0_i32, %c0_i32_0 : i32, i32
  }
  func.func @transform_14(%arg0: i32, %arg1: i32) -> (i32, i32) {
    %c0_i32 = arith.constant 0 : i32
    %c0_i32_0 = arith.constant 0 : i32
    %c0_i32_1 = arith.constant 0 : i32
    return %c0_i32, %c0_i32_0 : i32, i32
  }
  func.func @transform_15(%arg0: i32, %arg1: i32) -> (i32, i32, i32) {
    %c0_i32 = arith.constant 0 : i32
    %c0_i32_0 = arith.constant 0 : i32
    %c0_i32_1 = arith.constant 0 : i32
    return %arg0, %c0_i32, %c0_i32_0 : i32, i32, i32
  }
}

</mosaic_0001>

<bundles_post_ra>
// kernel: encoder_forward.1
= control target key start
LH: loop header
LB: loop body
LE: loop exit
PB: predicated region body
PF: predicated region fallthrough
CT: control target
= control target key end

     0   :  { %s2181_s18 = smov 0   ;;  %s2183_s19 = smov 0   ;;  %s2472_s0 = inlined_call_operand.vmem [shape: f32[2,8,32], index: 0, kind: input, shape index: {}]   ;;  %s2473_s1 = inlined_call_operand.vmem [shape: bf16[2,32,96], index: 1, kind: input, shape index: {}]   ;;  %s2474_s2 = inlined_call_operand.vmem [shape: f32[2,1,96], index: 2, kind: input, shape index: {}]   ;;  %s2475_s3 = inlined_call_operand.vmem [shape: bf16[2,32,32], index: 3, kind: input, shape index: {}]   ;;  %s2476_s4 = inlined_call_operand.vmem [shape: f32[2,1,32], index: 4, kind: input, shape index: {}]   ;;  %s2477_s5 = inlined_call_operand.vmem [shape: bf16[2,32,128], index: 5, kind: input, shape index: {}]   ;;  %s2478_s6 = inlined_call_operand.vmem [shape: f32[2,1,128], index: 6, kind: input, shape index: {}]   ;;  %s2479_s7 = inlined_call_operand.vmem [shape: bf16[2,128,32], index: 7, kind: input, shape index: {}]   ;;  %s2480_s8 = inlined_call_operand.vmem [shape: f32[2,1,32], index: 8, kind: input, shape index: {}]   ;;  %s2481_s9 = inlined_call_operand.vmem [shape: f32[2,1,32], index: 9, kind: input, shape index: {}]   ;;  %s2482_s10 = inlined_call_operand.vmem [shape: f32[2,1,32], index: 10, kind: input, shape index: {}]   ;;  %s2483_s11 = inlined_call_operand.vmem [shape: f32[2,1,32], index: 11, kind: input, shape index: {}]   ;;  %s2484_s12 = inlined_call_operand.vmem [shape: f32[2,1,32], index: 12, kind: input, shape index: {}]   ;;  %s2485_s13 = inlined_call_operand.vmem [shape: f32[1,32], index: 13, kind: input, shape index: {}]   ;;  %s2486_s14 = inlined_call_operand.vmem [shape: f32[1,32], index: 14, kind: input, shape index: {}]   ;;  %s2487_s15 = inlined_call_operand.vmem [shape: f32[2,8,32], index: 15, kind: output, shape index: {}]  }
   0x1   :  { %2493 = sst [smem:[#allocation9_spill]] %s2472_s0  ;;  %s2185_s20 = smov 0  }
   0x2   :  { %2494 = sst [smem:[#allocation10_spill]] %s2473_s1  ;;  %s2187_s21 = smov 0  }
   0x3   :  { %2495 = sst [smem:[#allocation11_spill]] %s2475_s3  ;;  %s2189_s22 = smov 0  }
   0x4   :  { %2496 = sst [smem:[#allocation12_spill]] %s2477_s5 }
   0x5   :  { %2497 = sst [smem:[#allocation13_spill]] %s2479_s7 }
   0x6   :  { %2498 = sst [smem:[#allocation14_spill]] %s2485_s13 }
   0x7   :  { %2499 = sst [smem:[#allocation15_spill]] %s2486_s14 }
   0x8   :  { %2500 = sst [smem:[#allocation16_spill]] %s2487_s15 }
   0x9 LB: > { %2501 = sst [smem:[#allocation2_spill]] %s2073_s18  ;;  %s34_s23 = sadd.s32 1, %s2081_s20  ;;  %s2089_s22 = sphi %s2189_s22, %s25_s22   ;;  %s2085_s21 = sphi %s2187_s21, %s2528_s21   ;;  %s2081_s20 = sphi %s2185_s20, %s2527_s20   ;;  %s2077_s19 = sphi %s2183_s19, %s2526_s19   ;;  %s2073_s18 = sphi %s2181_s18, %s2525_s18  }
   0xa   : > { %2502 = sst [smem:[#allocation3_spill]] %s2081_s20  ;;  %s37_s24 = sadd.s32 1, %s2085_s21 }
   0xb   : > { %2503 = sst [smem:[#allocation4_spill]] %s2085_s21  ;;  %p35_p0 = scmp.ge.s32.totalorder %s34_s23, 2 }
   0xc   : > { %2504 = sst [smem:[#allocation5_spill]] %s2089_s22  ;;  %p1784_p1 = scmp.ge.s32.totalorder %s2089_s22, 1 }
   0xd   : > { %p552_p2 = scmp.lt.s32.totalorder %s2089_s22, 5  ;;  %s2530_s23 = smov (%p35_p0, %s34_s23), 0 }
   0xe   : > { %2505 = sst [smem:[#allocation6_spill]] %s2530_s23  ;;  %s2532_s24 = smov (!%p35_p0, %s37_s24), %s2085_s21 }
   0xf   : > { %p553_p3 = pnand %p1784_p1, %p552_p2  ;;  %p39_p4 = scmp.ge.s32.totalorder %s2532_s24, 2 }
  0x11   : > { %s2534_s24 = smov (%p39_p4, %s2532_s24), 0  ;;  %556 = sbr.rel (%p553_p3) target bundleno = 2982 (0xba6), region = 80 }
  0x12   : > { %2506 = sst [smem:[#allocation7_spill]] %s2534_s24 }
  0x18   : > { %p642_p5 = scmp.lt.s32.totalorder %s2077_s19, 1  ;;  %p646_p6 = scmp.lt.s32.totalorder %s2073_s18, 1 }
  0x19   : > { %s2507_s0 = sld [smem:[#allocation9_spill]]  ;;  %s2508_s1 = sld [smem:[#allocation10_spill]] }
  0x1a   : > { %s2536_s19 = smov (!%p642_p5, %s2077_s19), 1  ;;  %s2509_s3 = sld [smem:[#allocation11_spill]] }
  0x1b   : > { %s2215_s25 = scalar_select %p646_p6, %s2073_s18, 1 }
  0x1c   : > { %s1785_s26 = sshll.u32 %s2536_s19, 3  ;;  %s2511_s5 = sld [smem:[#allocation12_spill]] }
  0x1d   : > { %s1835_s30 = sshll.u32 %s2215_s25, 4  ;;  %s1838_s21 = sshll.u32 %s2215_s25, 6 }
  0x1e   : > { %s2512_s7 = sld [smem:[#allocation13_spill]]  ;;  %s680_s27 = scalar_lea.vmem %s2481_s9, %s2215_s25 }
  0x1f   : > { %s645_s29 = scalar_lea.vmem %s2507_s0, %s1785_s26  ;;  %s650_s24 = scalar_lea.vmem %s2508_s1, %s1835_s30 }
  0x20   : > { %s2231_s13 = scalar_lea.vmem %s2509_s3, %s1835_s30  ;;  %s683_s15 = scalar_lea.vmem %s2482_s10, %s2215_s25 }
  0x21   : > { %2510 = sst [smem:[#allocation8_spill]] %s2231_s13  ;;  %s686_s1 = scalar_lea.vmem %s2483_s11, %s2215_s25 }
  0x22   : > { %s2240_s0 = scalar_lea.vmem %s2511_s5, %s1835_s30  ;;  %s689_s23 = scalar_lea.vmem %s2484_s12, %s2215_s25 }
  0x24   : > { %s2254_s13 = scalar_lea.vmem %s2512_s7, %s1838_s21  ;;  %s2513_s21 = sld [smem:[#allocation16_spill]] }
  0x25   : > { %s2514_s7 = sld [smem:[#allocation2_spill]] }
  0x2a   : > { %s2275_s22 = scalar_lea.vmem %s2513_s21, %s1785_s26 }
  0x2b   : > { %p1795_p7 = scmp.ne.s32.totalorder %s2514_s7, 0 }
  0x2c   : > { %v699_v0 = vld [vmem:[%s645_s29] sm:$0xff] (!%p1795_p7)  ;;  %vm700_vm0 = vcmask (!%p1795_p7), 261120  }
  0x2d   : > { %698 = sbr.rel (%p1795_p7) target bundleno = 52 (0x34), region = 84  ;;  %701 = vst.msk [vmem:[%s2275_s22] sm:$0xff] (!%p1795_p7), %vm700_vm0, %v699_v0 }
  0x34 PF: > { %v2015_v1 = vld [vmem:[%s650_s24] sm:$0xff]   ;;  %v2091_v2 = vmov 0.0   ;;  %v2016_v3 = vld [vmem:[%s650_s24 + $0x8] sm:$0xff]   ;;  %vm2092_vm1 = vmmov 0   ;;  %vm754_vm2 = vcmask 261120   ;;  %s2515_s24 = scalar_lea.vmem %s2474_s2, %s2215_s25  ;;  %s2093_s26 = smov 104   ;;  %v1009_v27 = vlaneseq }
  0x35   : > { %1873 = vmatprep.subr.bf16.mxu0 %v2091_v2  ;;  %1893 = vmatprep.subr.bf16.mxu1 %v2091_v2  ;;  %v2284_v4 = vld [vmem:[%s2275_s22] sm:$0xff]  ;;  %s2094_s29 = smov 120   ;;  %s2095_s14 = smov 112   ;;  %vm815_vm3 = vcmask 64512   ;;  %vm1071_vm5 = vcmask 1043456   ;;  %vm1272_vm6 = vcmask 130048  }
  0x36   : > { %1874 = vmatpush3.bf16.msra.mxu0 %v2015_v1  ;;  %1877 = vmatprep.mubr.msk.bf16.mxu0 %vm2092_vm1, %v2091_v2  ;;  %v735_v5 = vpack.c.bf16 %v2284_v4, %v2284_v4  ;;  %v1796_v6 = vld [vmem:[%s2515_s24] ss:$0 sm:$0xff]  ;;  %s2096_s18 = smov 96   ;;  %v1010_v28 = vand.u32 127, %v1009_v27  ;;  %s2097_s19 = smov 64   ;;  %vm1274_vm7 = vcmask 195584  }
  0x37   : > { %1875 = vmatprep.subr.bf16.mxu0 %v2091_v2  ;;  %1895 = vmatprep.mubr.msk.bf16.mxu1 %vm2092_vm1, %v2091_v2  ;;  %s2516_s30 = sld [smem:[#allocation8_spill]]  ;;  %s2098_s28 = smov 8  }
  0x38   : > { %vm1011_vm4 = vcmp.lt.s32.totalorder %v1010_v28, 6  ;;  %s2099_s16 = smov 16   ;;  %s2100_s17 = smov 24  }
  0x39   : > { %s2517_s21 = scalar_lea.vmem %s2476_s4, %s2215_s25 }
  0x3a   : > { %1876 = vmatpush3.bf16.msra.mxu0 %v2016_v3 }
  0x3b   : > { %1881 = vmatprep.subr.bf16.mxu0 %v2091_v2 }
  0x3d   : > { %1878 = vmatmul.mubr.msk.bf16.vlgmr.msra.gmra.mrb[0].mxu0 %vm754_vm2, %v735_v5 }
  0x3e   : > { %1883 = vmatprep.mubr.msk.bf16.mxu0 %vm2092_vm1, %v2091_v2 }
 0x110   : > { %v792_v7 = vpop.f32.mrb[0].mxu0 }
 0x111   : > { %v793_v8 = vadd.f32 %v1796_v6, %v792_v7  ;;  %v1879_v9 = vpop.f32.mrb[1].mxu0 }
 0x112   : > { %v795_v10 = vpop.f32.mrb[2].mxu0 }
 0x113   : > { %805 = vrot.lane.b32.xlu1 %v793_v8, %s2093_s26  ;;  %799 = vrot.lane.b32.xlu0 %v793_v8, %s2094_s29  ;;  %v1880_v11 = vpop.f32.mrb[3].mxu0  ;;  %v2300_v12 = vpack.c.bf16 %v793_v8, %v793_v8  ;;  %s2518_s29 = scalar_lea.vmem %s2478_s6, %s2215_s25 }
 0x117   : > { %802 = vrot.lane.b32.xlu0 %v793_v8, %s2095_s14  ;;  %813 = vrot.lane.b32.xlu1 %v2300_v12, %s2096_s18 }
 0x185   : > { %v806_v13 = vpop.permute.xlu1 %805  ;;  %v800_v14 = vpop.permute.xlu0 %799 }
 0x186   : > { %v2303_v15 = vpack.c.bf16 %v800_v14, %v800_v14  ;;  %v2306_v18 = vpack.c.bf16 %v806_v13, %v806_v13 }
 0x188   : > { %863 = vrot.lane.b32.xlu0 %v2303_v15, %s2096_s18 }
 0x189   : > { %v803_v16 = vpop.permute.xlu0 %802  ;;  %v814_v17 = vpop.permute.xlu1 %813 }
 0x18a   : > { %v2308_v19 = vpack.c.bf16 %v803_v16, %v803_v16  ;;  %v820_v20 = vsel %vm815_vm3, %v814_v17, 0 }
 0x18b   : > { %1882 = vmatpush3.bf16.xpose.msra.mxu0 %v820_v20 }
 0x18c   : > { %961 = vrot.lane.b32.xlu0 %v2306_v18, %s2096_s18  ;;  %912 = vrot.lane.b32.xlu1 %v2308_v19, %s2096_s18  ;;  %s2519_s18 = scalar_lea.vmem %s2480_s8, %s2215_s25 }
 0x18d   : > { %1887 = vmatprep.subr.bf16.mxu0 %v2091_v2 }
 0x192   : > { %1884 = vmatmul.mubr.msk.bf16.vlgmr.msra.gmra.mrb[4].mxu0 %vm815_vm3, %v2300_v12 }
 0x193   : > { %1889 = vmatprep.mubr.msk.bf16.mxu0 %vm2092_vm1, %v2091_v2 }
 0x1fa   : > { %v864_v21 = vpop.permute.xlu0 %863 }
 0x1fb   : > { %v869_v22 = vsel %vm815_vm3, %v864_v21, 0 }
 0x1fc   : > { %1888 = vmatpush3.bf16.xpose.msra.mxu0 %v869_v22 }
 0x1fd   : > { %1899 = vmatprep.subr.bf16.mxu0 %v2091_v2 }
 0x1fe   : > { %v913_v23 = vpop.permute.xlu1 %912  ;;  %v962_v25 = vpop.permute.xlu0 %961 }
 0x1ff   : > { %v918_v24 = vsel %vm815_vm3, %v913_v23, 0  ;;  %v967_v26 = vsel %vm815_vm3, %v962_v25, 0 }
 0x200   : > { %1894 = vmatpush3.bf16.xpose.msra.mxu1 %v918_v24 }
 0x201   : > { %1905 = vmatprep.subr.bf16.mxu1 %v2091_v2 }
 0x203   : > { %1890 = vmatmul.mubr.msk.bf16.vlgmr.msra.gmra.mrb[8].mxu0 %vm815_vm3, %v2303_v15 }
 0x204   : > { %1900 = vmatpush3.bf16.xpose.msra.mxu0 %v967_v26  ;;  %1901 = vmatprep.mubr.msk.bf16.mxu0 %vm2092_vm1, %v2091_v2 }
 0x205   : > { %1911 = vmatprep.subr.bf16.mxu0 %v2091_v2 }
 0x207   : > { %1896 = vmatmul.mubr.msk.bf16.vlgmr.msra.gmra.mrb[0].mxu1 %vm815_vm3, %v2308_v19 }
 0x208   : > { %1907 = vmatprep.mubr.msk.bf16.mxu1 %vm2092_vm1, %v2091_v2 }
 0x20b   : > { %1902 = vmatmul.mubr.msk.bf16.vlgmr.msra.gmra.mrb[12].mxu0 %vm815_vm3, %v2306_v18 }
 0x20c   : > { %1913 = vmatprep.mubr.msk.bf16.mxu0 %vm2092_vm1, %v2091_v2 }
 0x265   : > { %v856_v29 = vpop.f32.mrb[4].mxu0 }
 0x266   : > { %v1014_v30 = vsel %vm1011_vm4, %v856_v29, -1e+30  ;;  %v1885_v31 = vpop.f32.mrb[5].mxu0 }
 0x267   : > { %v859_v32 = vpop.f32.mrb[6].mxu0  ;;  %v1018_v33 = vsel %vm815_vm3, %v1014_v30, -inf }
 0x268   : > { %1019 = vmax.xlane.f32.xlu1 %v1018_v33  ;;  %v1886_v34 = vpop.f32.mrb[7].mxu0 }
 0x2d6   : > { %v905_v35 = vpop.f32.mrb[8].mxu0 }
 0x2d7   : > { %v1015_v36 = vsel %vm1011_vm4, %v905_v35, -1e+30  ;;  %v1891_v37 = vpop.f32.mrb[9].mxu0 }
 0x2d8   : > { %v908_v38 = vpop.f32.mrb[10].mxu0  ;;  %v1021_v39 = vsel %vm815_vm3, %v1015_v36, -inf }
 0x2d9   : > { %1022 = vmax.xlane.f32.xlu0 %v1021_v39  ;;  %v1892_v40 = vpop.f32.mrb[11].mxu0  ;;  %v2017_v39 = vld [vmem:[%s2516_s30] sm:$0xff]  }
 0x2da   : > { %v954_v41 = vpop.f32.mrb[0].mxu1  ;;  %v2018_v40 = vld [vmem:[%s2516_s30 + $0x8] sm:$0xff]  }
 0x2db   : > { %v1016_v42 = vsel %vm1011_vm4, %v954_v41, -1e+30  ;;  %v1897_v43 = vpop.f32.mrb[1].mxu1 }
 0x2dc   : > { %v957_v44 = vpop.f32.mrb[2].mxu1  ;;  %v1024_v45 = vsel %vm815_vm3, %v1016_v42, -inf }
 0x2dd   : > { %v1898_v46 = vpop.f32.mrb[3].mxu1  ;;  %1025 = vmax.xlane.f32.xlu0 %v1024_v45 }
 0x2de   : > { %v1003_v47 = vpop.f32.mrb[12].mxu0 }
 0x2df   : > { %v1017_v48 = vsel %vm1011_vm4, %v1003_v47, -1e+30  ;;  %v1903_v49 = vpop.f32.mrb[13].mxu0 }
 0x2e0   : > { %v1006_v50 = vpop.f32.mrb[14].mxu0  ;;  %v1027_v51 = vsel %vm815_vm3, %v1017_v48, -inf }
 0x2e1   : > { %1028 = vmax.xlane.f32.xlu1 %v1027_v51  ;;  %v1904_v52 = vpop.f32.mrb[15].mxu0 }
 0x2f2   : > { %1115 = vrot.lane.b32.xlu1 %v2303_v15, %s2097_s19 }
 0x2f3   : > { %1066 = vrot.lane.b32.xlu0 %v2300_v12, %s2097_s19 }
 0x2f5   : > { %v1020_v53 = vpop.xlane.xlu1 %1019 }
 0x2f6   : > { %v1030_v54 = vsub.f32 %v1014_v30, %v1020_v53 }
 0x2f8   : > { %v1034_v55 = vmul.f32 1.442695, %v1030_v54 }
 0x2fa   : > { %2029 = vpow2.f32 %v1034_v55 }
 0x304   : > { %v2030_v56 = vpop.eup %2029 }
 0x305   : > { %v1042_v57 = vsel %vm815_vm3, %v2030_v56, 0.0 }
 0x312   : > { %1043 = vadd.xlane.f32.xlu0 %v1042_v57 }
 0x366   : > { %v1023_v58 = vpop.xlane.xlu0 %1022 }
 0x367   : > { %v1031_v59 = vsub.f32 %v1015_v36, %v1023_v58 }
 0x369   : > { %v1036_v60 = vmul.f32 1.442695, %v1031_v59 }
 0x36a   : > { %v1026_v61 = vpop.xlane.xlu0 %1025 }
 0x36b   : > { %2031 = vpow2.f32 %v1036_v60  ;;  %v1032_v62 = vsub.f32 %v1016_v42, %v1026_v61  ;;  %v1808_v60 = vld [vmem:[%s2517_s21] ss:$0 sm:$0xff] }
 0x36d   : > { %v1038_v63 = vmul.f32 1.442695, %v1032_v62 }
 0x36e   : > { %v1067_v0 = vpop.permute.xlu0 %1066  ;;  %v1029_v1 = vpop.xlane.xlu1 %1028 }
 0x36f   : > { %2033 = vpow2.f32 %v1038_v63  ;;  %v1073_v3 = vsel %vm1071_vm5, %v1067_v0, 0  ;;  %v1033_v5 = vsub.f32 %v1017_v48, %v1029_v1 }
 0x370   : > { %1906 = vmatpush3.bf16.msra.mxu1 %v1073_v3 }
 0x371   : > { %v1040_v6 = vmul.f32 1.442695, %v1033_v5  ;;  %1917 = vmatprep.subr.bf16.mxu1 %v2091_v2 }
 0x372   : > { %v1116_v7 = vpop.permute.xlu1 %1115 }
 0x373   : > { %2035 = vpow2.f32 %v1040_v6  ;;  %v1121_v8 = vsel %vm1071_vm5, %v1116_v7, 0 }
 0x374   : > { %1912 = vmatpush3.bf16.msra.mxu0 %v1121_v8 }
 0x375   : > { %v2032_v9 = vpop.eup %2031  ;;  %1923 = vmatprep.subr.bf16.mxu0 %v2091_v2 }
 0x376   : > { %v1045_v10 = vsel %vm815_vm3, %v2032_v9, 0.0 }
 0x377   : > { %1046 = vadd.xlane.f32.xlu1 %v1045_v10 }
 0x379   : > { %v2034_v11 = vpop.eup %2033 }
 0x37a   : > { %v1048_v12 = vsel %vm815_vm3, %v2034_v11, 0.0 }
 0x37b   : > { %1049 = vadd.xlane.f32.xlu0 %v1048_v12  ;;  %v2020_v12 = vld [vmem:[%s2240_s0 + $0x8] sm:$0xff]  }
 0x37d   : > { %v2036_v13 = vpop.eup %2035 }
 0x37e   : > { %v1051_v14 = vsel %vm815_vm3, %v2036_v13, 0.0 }
 0x37f   : > { %1052 = vadd.xlane.f32.xlu1 %v1051_v14  ;;  %v2023_v14 = vld [vmem:[%s2254_s13 + $0x10] sm:$0xff]  }
 0x390   : > { %1163 = vrot.lane.b32.xlu1 %v2308_v19, %s2097_s19 }
 0x391   : > { %1211 = vrot.lane.b32.xlu0 %v2306_v18, %s2097_s19 }
 0x39f   : > { %v1044_v15 = vpop.xlane.xlu0 %1043 }
 0x3a0   : > { %2037 = vrcp.f32 %v1044_v15  ;;  %v2024_v15 = vld [vmem:[%s2254_s13 + $0x18] sm:$0xff]  }
 0x3aa   : > { %v2038_v16 = vpop.eup %2037 }
 0x3ab   : > { %v1055_v17 = vmul.f32 %v2038_v16, %v2030_v56  ;;  %v2025_v16 = vld [vmem:[%s2254_s13 + $0x20] sm:$0xff]  }
 0x3ad   : > { %v1062_v20 = vpack.c.bf16 %v1055_v17, %v1055_v17  ;;  %v2026_v17 = vld [vmem:[%s2254_s13 + $0x28] sm:$0xff]  }
 0x3af   : > { %1908 = vmatmul.mubr.msk.bf16.vlgmr.msra.gmra.mrb[4].mxu1 %vm815_vm3, %v1062_v20 }
 0x3b0   : > { %1919 = vmatprep.mubr.msk.bf16.mxu1 %vm2092_vm1, %v2091_v2 }
 0x404   : > { %v1047_v21 = vpop.xlane.xlu1 %1046 }
 0x405   : > { %2039 = vrcp.f32 %v1047_v21 }
 0x408   : > { %v1050_v22 = vpop.xlane.xlu0 %1049 }
 0x409   : > { %2041 = vrcp.f32 %v1050_v22 }
 0x40c   : > { %v1053_v23 = vpop.xlane.xlu1 %1052  ;;  %v1212_v18 = vpop.permute.xlu0 %1211 }
 0x40d   : > { %2043 = vrcp.f32 %v1053_v23  ;;  %v1217_v30 = vsel %vm1071_vm5, %v1212_v18, 0 }
 0x40f   : > { %v2040_v19 = vpop.eup %2039 }
 0x410   : > { %v1057_v24 = vmul.f32 %v2040_v19, %v2032_v9  ;;  %v1164_v25 = vpop.permute.xlu1 %1163  ;;  %v1812_v19 = vld [vmem:[%s680_s27] ss:$0 sm:$0xff] }
 0x411   : > { %v1169_v26 = vsel %vm1071_vm5, %v1164_v25, 0  ;;  %v1813_v25 = vld [vmem:[%s683_s15] ss:$0 sm:$0xff] }
 0x412   : > { %1918 = vmatpush3.bf16.msra.mxu1 %v1169_v26  ;;  %v1063_v27 = vpack.c.bf16 %v1057_v24, %v1057_v24 }
 0x413   : > { %v2042_v28 = vpop.eup %2041  ;;  %1929 = vmatprep.subr.bf16.mxu1 %v2091_v2 }
 0x414   : > { %v1059_v29 = vmul.f32 %v2042_v28, %v2034_v11  ;;  %1914 = vmatmul.mubr.msk.bf16.vlgmr.msra.gmra.mrb[16].mxu0 %vm815_vm3, %v1063_v27  ;;  %v2019_v11 = vld [vmem:[%s2240_s0] sm:$0xff]   ;;  %v2027_v28 = vld [vmem:[%s2254_s13 + $0x30] sm:$0xff]  }
 0x415   : > { %1924 = vmatpush3.bf16.msra.mxu0 %v1217_v30  ;;  %1925 = vmatprep.mubr.msk.bf16.mxu0 %vm2092_vm1, %v2091_v2  ;;  %v1814_v30 = vld [vmem:[%s2518_s29] ss:$0 sm:$0xff] }
 0x416   : > { %v1064_v31 = vpack.c.bf16 %v1059_v29, %v1059_v29  ;;  %1937 = vmatprep.subr.bf16.mxu0 %v2091_v2  ;;  %v2028_v29 = vld [vmem:[%s2254_s13 + $0x38] sm:$0xff]  }
 0x417   : > { %v2044_v32 = vpop.eup %2043 }
 0x418   : > { %v1061_v33 = vmul.f32 %v2044_v32, %v2036_v13  ;;  %1920 = vmatmul.mubr.msk.bf16.vlgmr.msra.gmra.mrb[8].mxu1 %vm815_vm3, %v1064_v31  ;;  %v2022_v13 = vld [vmem:[%s2254_s13 + $0x8] sm:$0xff]  }
 0x419   : > { %1933 = vmatprep.mubr.msk.bf16.mxu1 %vm2092_vm1, %v2091_v2  ;;  %1930 = vmatpush3.bf16.msra.mxu1 %v2017_v39 }
 0x41a   : > { %v1065_v34 = vpack.c.bf16 %v1061_v33, %v1061_v33  ;;  %1931 = vmatprep.subr.bf16.mxu1 %v2091_v2 }
 0x41c   : > { %1926 = vmatmul.mubr.msk.bf16.vlgmr.msra.gmra.mrb[20].mxu0 %vm815_vm3, %v1065_v34 }
 0x41d   : > { %1941 = vmatprep.mubr.msk.bf16.mxu0 %vm2092_vm1, %v2091_v2  ;;  %1932 = vmatpush3.bf16.msra.mxu1 %v2018_v40 }
 0x41e   : > { %1945 = vmatprep.subr.bf16.mxu1 %v2091_v2  ;;  %1938 = vmatpush3.bf16.msra.mxu0 %v2019_v11 }
 0x41f   : > { %1939 = vmatprep.subr.bf16.mxu0 %v2091_v2 }
 0x422   : > { %1940 = vmatpush3.bf16.msra.mxu0 %v2020_v12 }
 0x482   : > { %v1109_v35 = vpop.f32.mrb[4].mxu1 }
 0x483   : > { %v1909_v36 = vpop.f32.mrb[5].mxu1 }
 0x484   : > { %v1112_v37 = vpop.f32.mrb[6].mxu1 }
 0x485   : > { %v1910_v38 = vpop.f32.mrb[7].mxu1 }
 0x4e7   : > { %v1157_v41 = vpop.f32.mrb[16].mxu0 }
 0x4e8   : > { %1260 = vrot.lane.b32.xlu1 %v1157_v41, %s2098_s28  ;;  %v1915_v42 = vpop.f32.mrb[17].mxu0 }
 0x4e9   : > { %v1160_v43 = vpop.f32.mrb[18].mxu0 }
 0x4ea   : > { %v1916_v44 = vpop.f32.mrb[19].mxu0 }
 0x4eb   : > { %v1205_v45 = vpop.f32.mrb[8].mxu1 }
 0x4ec   : > { %1264 = vrot.lane.b32.xlu0 %v1205_v45, %s2099_s16  ;;  %v1921_v46 = vpop.f32.mrb[9].mxu1  ;;  %s2520_s16 = sld [smem:[#allocation2_spill]] }
 0x4ed   : > { %v1208_v47 = vpop.f32.mrb[10].mxu1 }
 0x4ee   : > { %v1922_v48 = vpop.f32.mrb[11].mxu1 }
 0x4ef   : > { %v1253_v49 = vpop.f32.mrb[20].mxu0 }
 0x4f0   : > { %1268 = vrot.lane.b32.xlu1 %v1253_v49, %s2100_s17  ;;  %v1927_v50 = vpop.f32.mrb[21].mxu0 }
 0x4f1   : > { %v1256_v51 = vpop.f32.mrb[22].mxu0 }
 0x4f2   : > { %v1928_v52 = vpop.f32.mrb[23].mxu0  ;;  %p1829_p8 = scmp.ge.s32.totalorder %s2520_s16, 1 }
 0x55a   : > { %v1261_v53 = vpop.permute.xlu1 %1260 }
 0x55b   : > { %v1271_v55 = vsel %vm815_vm3, %v1109_v35, %v1261_v53 }
 0x55e   : > { %v1265_v54 = vpop.permute.xlu0 %1264 }
 0x55f   : > { %v1273_v56 = vsel %vm1272_vm6, %v1271_v55, %v1265_v54  ;;  %v1827_v54 = vld [vmem:[%s686_s1] ss:$0 sm:$0xff] }
 0x562   : > { %v1269_v57 = vpop.permute.xlu1 %1268 }
 0x563   : > { %v1275_v58 = vsel %vm1274_vm7, %v1273_v56, %v1269_v57  ;;  %v1828_v56 = vld [vmem:[%s689_s23] ss:$0 sm:$0xff] }
 0x564   : > { %v1276_v59 = vpack.c.bf16 %v1275_v58, %v1275_v58 }
 0x566   : > { %1934 = vmatmul.mubr.msk.bf16.vlgmr.msra.gmra.mrb[12].mxu1 %vm754_vm2, %v1276_v59 }
 0x567   : > { %1961 = vmatprep.mubr.msk.bf16.mxu1 %vm2092_vm1, %v2091_v2 }
 0x639   : > { %v1332_v61 = vpop.f32.mrb[12].mxu1 }
 0x63a   : > { %v1333_v62 = vadd.f32 %v1808_v60, %v1332_v61  ;;  %v1935_v63 = vpop.f32.mrb[13].mxu1 }
 0x63b   : > { %v1335_v0 = vpop.f32.mrb[14].mxu1 }
 0x63c   : > { %v1936_v1 = vpop.f32.mrb[15].mxu1  ;;  %v1338_v3 = vadd.f32 %v1333_v62, %v2284_v4  ;;  %v2021_v4 = vld [vmem:[%s2254_s13] sm:$0xff]  }
 0x63d   : > { %1946 = vmatpush3.bf16.msra.mxu1 %v2021_v4 }
 0x63e   : > { %v1341_v5 = vsel %vm754_vm2, %v1338_v3, 0.0  ;;  %1947 = vmatprep.subr.bf16.mxu1 %v2091_v2 }
 0x63f   : > { %1342 = vadd.xlane.f32.xlu0 %v1341_v5 }
 0x641   : > { %1948 = vmatpush3.bf16.msra.mxu1 %v2022_v13 }
 0x642   : > { %1949 = vmatprep.subr.bf16.mxu1 %v2091_v2 }
 0x645   : > { %1950 = vmatpush3.bf16.msra.mxu1 %v2023_v14 }
 0x646   : > { %1951 = vmatprep.subr.bf16.mxu1 %v2091_v2 }
 0x649   : > { %1952 = vmatpush3.bf16.msra.mxu1 %v2024_v15 }
 0x64a   : > { %1953 = vmatprep.subr.bf16.mxu1 %v2091_v2 }
 0x64d   : > { %1954 = vmatpush3.bf16.msra.mxu1 %v2025_v16 }
 0x64e   : > { %1955 = vmatprep.subr.bf16.mxu1 %v2091_v2 }
 0x651   : > { %1956 = vmatpush3.bf16.msra.mxu1 %v2026_v17 }
 0x652   : > { %1957 = vmatprep.subr.bf16.mxu1 %v2091_v2 }
 0x655   : > { %1958 = vmatpush3.bf16.msra.mxu1 %v2027_v28 }
 0x656   : > { %1959 = vmatprep.subr.bf16.mxu1 %v2091_v2  ;;  %v1818_v2 = vld [vmem:[%s2519_s18] ss:$0 sm:$0xff] }
 0x659   : > { %1960 = vmatpush3.bf16.msra.mxu1 %v2028_v29 }
 0x6cc   : > { %v1343_v6 = vpop.xlane.xlu0 %1342 }
 0x6cd   : > { %v1345_v7 = vmul.f32 0.03125, %v1343_v6 }
 0x6cf   : > { %v1346_v8 = vsub.f32 %v1338_v3, %v1345_v7 }
 0x6d1   : > { %v1347_v9 = vmul.f32 %v1346_v8, %v1346_v8 }
 0x6d3   : > { %v1348_v10 = vsel %vm754_vm2, %v1347_v9, 0.0 }
 0x6d4   : > { %1349 = vadd.xlane.f32.xlu1 %v1348_v10 }
 0x761   : > { %v1350_v20 = vpop.xlane.xlu1 %1349 }
 0x762   : > { %v1351_v21 = vmul.f32 0.03125, %v1350_v20 }
 0x764   : > { %v1352_v22 = vadd.f32 1e-05, %v1351_v21 }
 0x766   : > { %2045 = vrsqrt.f32 %v1352_v22 }
 0x770   : > { %v2046_v23 = vpop.eup %2045 }
 0x771   : > { %v1354_v24 = vmul.f32 %v2046_v23, %v1346_v8 }
 0x773   : > { %v1361_v18 = vmul.f32 %v1812_v19, %v1354_v24 }
 0x775   : > { %v1368_v26 = vadd.f32 %v1813_v25, %v1361_v18 }
 0x777   : > { %v1369_v27 = vpack.c.bf16 %v1368_v26, %v1368_v26 }
 0x779   : > { %1942 = vmatmul.mubr.msk.bf16.vlgmr.msra.gmra.mrb[24].mxu0 %vm754_vm2, %v1369_v27 }
 0x84c   : > { %v1425_v31 = vpop.f32.mrb[24].mxu0 }
 0x84d   : > { %v1426_v32 = vadd.f32 %v1814_v30, %v1425_v31  ;;  %v1943_v33 = vpop.f32.mrb[25].mxu0 }
 0x84e   : > { %v1428_v34 = vpop.f32.mrb[26].mxu0 }
 0x84f   : > { %v1431_v35 = vmax.f32 %v1426_v32, 0.0  ;;  %v1944_v36 = vpop.f32.mrb[27].mxu0 }
 0x851   : > { %v1432_v37 = vpack.c.bf16 %v1431_v35, %v1431_v35 }
 0x853   : > { %1962 = vmatmul.mubr.bf16.vlgmr.msra.gmra.mrb[16].mxu1 %v1432_v37 }
 0x926   : > { %v1521_v38 = vpop.f32.mrb[16].mxu1 }
 0x927   : > { %v1522_v39 = vadd.f32 %v1818_v2, %v1521_v38  ;;  %v1963_v40 = vpop.f32.mrb[17].mxu1 }
 0x928   : > { %v1524_v41 = vpop.f32.mrb[18].mxu1 }
 0x929   : > { %v1964_v42 = vpop.f32.mrb[19].mxu1  ;;  %v1527_v43 = vadd.f32 %v1522_v39, %v1368_v26 }
 0x92b   : > { %v1530_v44 = vsel %vm754_vm2, %v1527_v43, 0.0 }
 0x92c   : > { %1531 = vadd.xlane.f32.xlu0 %v1530_v44 }
 0x9b9   : > { %v1532_v45 = vpop.xlane.xlu0 %1531 }
 0x9ba   : > { %v1533_v46 = vmul.f32 0.03125, %v1532_v45 }
 0x9bc   : > { %v1534_v47 = vsub.f32 %v1527_v43, %v1533_v46 }
 0x9be   : > { %v1535_v48 = vmul.f32 %v1534_v47, %v1534_v47 }
 0x9c0   : > { %v1536_v49 = vsel %vm754_vm2, %v1535_v48, 0.0 }
 0x9c1   : > { %1537 = vadd.xlane.f32.xlu0 %v1536_v49 }
 0xa4e   : > { %v1538_v50 = vpop.xlane.xlu0 %1537 }
 0xa4f   : > { %v1539_v51 = vmul.f32 0.03125, %v1538_v50 }
 0xa51   : > { %v1540_v52 = vadd.f32 1e-05, %v1539_v51 }
 0xa53   : > { %2047 = vrsqrt.f32 %v1540_v52 }
 0xa5c   : > { %1560 = sbr.rel (%p1829_p8) target bundleno = 2661 (0xa65), region = 88 }
 0xa5d   : > { %v2048_v53 = vpop.eup %2047 }
 0xa5e   : > { %v1542_v55 = vmul.f32 %v2048_v53, %v1534_v47 }
 0xa60   : > { %v1549_v57 = vmul.f32 %v1827_v54, %v1542_v55 }
 0xa62   : > { %v1556_v58 = vadd.f32 %v1828_v56, %v1549_v57 }
 0xa64   : > { %1561 = vst.msk [vmem:[%s2275_s22] sm:$0xff] %vm754_vm2, %v1556_v58 }
 0xa65 PF: > { %s2521_s17 = sld [smem:[#allocation2_spill]] }
 0xa6b   : > { %p1830_p9 = scmp.ne.s32.totalorder %s2521_s17, 1 }
 0xa6c   : > { %v1568_v59 = vsel (!%p1830_p9), %vm754_vm2, %v1556_v58, 0.0  ;;  %s2522_s23 = sld [smem:[#allocation14_spill]] (!%p1830_p9)  ;;  %s2523_s21 = sld [smem:[#allocation15_spill]] (!%p1830_p9) }
 0xa6d   : > { %1565 = sbr.rel (%p1830_p9) target bundleno = 2982 (0xba6), region = 92  ;;  %1569 = vadd.xlane.f32.xlu0 (!%p1830_p9), %v1568_v59 }
 0xa72   : > { %v1831_v7 = vld [vmem:[%s2522_s23] ss:$0 sm:$0xff] (!%p1830_p9) }
 0xa73   : > { %v1832_v9 = vld [vmem:[%s2523_s21] ss:$0 sm:$0xff] (!%p1830_p9) }
 0xafa   : > { %v1570_v60 = vpop.xlane.xlu0 %1569 }
 0xafb   : > { %v1571_v61 = vmul.f32 0.03125, %v1570_v60 }
 0xafd   : > { %v1572_v62 = vsub.f32 %v1556_v58, %v1571_v61 }
 0xaff   : > { %v1573_v63 = vmul.f32 %v1572_v62, %v1572_v62 }
 0xb01   : > { %v1574_v0 = vsel %vm754_vm2, %v1573_v63, 0.0 }
 0xb02   : > { %1575 = vadd.xlane.f32.xlu0 %v1574_v0 }
 0xb8f   : > { %v1576_v1 = vpop.xlane.xlu0 %1575 }
 0xb90   : > { %v1577_v3 = vmul.f32 0.03125, %v1576_v1 }
 0xb92   : > { %v1578_v5 = vadd.f32 1e-05, %v1577_v3 }
 0xb94   : > { %2049 = vrsqrt.f32 %v1578_v5 }
 0xb9e   : > { %v2050_v6 = vpop.eup %2049 }
 0xb9f   : > { %v1580_v8 = vmul.f32 %v2050_v6, %v1572_v62 }
 0xba1   : > { %v1587_v10 = vmul.f32 %v1831_v7, %v1580_v8 }
 0xba3   : > { %v1594_v11 = vadd.f32 %v1832_v9, %v1587_v10 }
 0xba5   : > { %1595 = vst.msk [vmem:[%s2275_s22] sm:$0xff] %vm754_vm2, %v1594_v11 }
 0xba6 PF: > { %s2524_s0 = sld [smem:[#allocation5_spill]]  ;;  %s2525_s18 = sld [smem:[#allocation3_spill]] }
 0xba7   : > { %s2526_s19 = sld [smem:[#allocation4_spill]]  ;;  %s2527_s20 = sld [smem:[#allocation6_spill]] }
 0xba8   : > { %s2528_s21 = sld [smem:[#allocation7_spill]] }
 0xbac   : > { %s25_s22 = sadd.s32 1, %s2524_s0  }
 0xbad   : > { %p22_p10 = scmp.ge.s32.totalorder %s25_s22, 6  }
 0xbaf   :  { %24 = sbr.rel (!%p22_p10) target bundleno = 9 (0x9), region = 158 }

</bundles_post_ra>
